<compile_context>
chip_gen: v6e
topology: v6e:2x2x1
jax: 0.10.0
libtpu: 0.0.40
codegen_flags: <defaults>
</compile_context>

<pallas_src>
import functools

import jax
import jax.numpy as jnp
from jax.experimental import pallas as pl
from jax.experimental.pallas import tpu as pltpu


def _disc_kernel(x_ref, w1_ref, b1_ref, w2_ref, b2_ref, w3_ref, b3_ref,
                 w4_ref, b4_ref, o_ref):
    """Fused MLP discriminator forward for one batch tile.

    x_ref:  (block_b, D_in_pad)  bf16
    wN_ref: (in_N, out_N)        bf16        bN_ref: (1, out_N) f32
    o_ref:  (block_b, 128)       f32  -- lane-dense; only column 0 is the real sigmoid(logit).
    """
    neg_slope = jnp.float32(0.2)

    def leaky(h):                       # LeakyReLU(0.2); Dropout = identity (eval mode)
        return jnp.maximum(h, neg_slope * h)

    # bf16 MXU inputs, f32 accumulation; bias add + activations in f32.
    h = jnp.dot(x_ref[...], w1_ref[...], preferred_element_type=jnp.float32) + b1_ref[...]
    h = leaky(h)

    h = jnp.dot(h.astype(jnp.bfloat16), w2_ref[...],
                preferred_element_type=jnp.float32) + b2_ref[...]
    h = leaky(h)

    h = jnp.dot(h.astype(jnp.bfloat16), w3_ref[...],
                preferred_element_type=jnp.float32) + b3_ref[...]
    h = leaky(h)

    logits = jnp.dot(h.astype(jnp.bfloat16), w4_ref[...],
                     preferred_element_type=jnp.float32) + b4_ref[...]
    # Full 128-wide lane-dense store (unmasked vst); host keeps only column 0.
    o_ref[...] = jax.nn.sigmoid(logits).astype(o_ref.dtype)


def _pick_block_b(batch, max_block=1024):
    """Fattest batch tile <= max_block, multiple of 128, keeping >=2 grid steps when
    the batch allows (v7x has 2 TensorCores; 'parallel' only helps with >=2 steps)."""
    b128 = ((batch + 127) // 128) * 128
    if b128 >= 256:
        blk = min(max_block, (b128 // 2) // 128 * 128)
    else:
        blk = 128
    return max(blk, 128)


@functools.partial(jax.jit, static_argnames=("block_b",))
def discriminator_forward(x, params, *, block_b=None):
    """x: (B, input_dim) float32. Returns (B, 1) float32 in [0, 1]."""
    w1, b1, w2, b2, w3, b3, w4p, b4p = params
    B, D_in = x.shape
    D_in_pad, H = w1.shape
    H_pad = w4p.shape[1]

    if block_b is None:
        block_b = _pick_block_b(B)
    assert block_b % 128 == 0

    # Lane-align input features (zero-pad to D_in_pad; W1's pad rows are zero) and cast
    # to bf16. With allow_input_fusion=[0] this cast/pad fuses into the pallas input read
    # instead of materializing a padded bf16 copy of x in HBM.
    xb = x.astype(jnp.bfloat16)
    if D_in_pad != D_in:
        xb = jnp.pad(xb, ((0, 0), (0, D_in_pad - D_in)))

    # Pad batch to a multiple of block_b; extra rows are sliced off after the call.
    B_pad = ((B + block_b - 1) // block_b) * block_b
    if B_pad != B:
        xb = jnp.pad(xb, ((0, B_pad - B), (0, 0)))

    grid = (B_pad // block_b,)
    batch_map = lambda i: (i, 0)
    weight_map = lambda i: (0, 0)   # constant block index -> weights stay resident in VMEM

    out = pl.pallas_call(
        _disc_kernel,
        out_shape=jax.ShapeDtypeStruct((B_pad, H_pad), jnp.float32),
        grid_spec=pltpu.PrefetchScalarGridSpec(
            num_scalar_prefetch=0,
            grid=grid,
            in_specs=[
                pl.BlockSpec((block_b, D_in_pad), batch_map),   # x tile (streams)
                pl.BlockSpec((D_in_pad, H), weight_map),        # W1 (resident)
                pl.BlockSpec((1, H), weight_map),               # b1
                pl.BlockSpec((H, H), weight_map),               # W2
                pl.BlockSpec((1, H), weight_map),               # b2
                pl.BlockSpec((H, H), weight_map),               # W3
                pl.BlockSpec((1, H), weight_map),               # b3
                pl.BlockSpec((H, H_pad), weight_map),           # W4 (padded to 128 cols)
                pl.BlockSpec((1, H_pad), weight_map),           # b4 (padded)
            ],
            out_specs=pl.BlockSpec((block_b, H_pad), batch_map),  # lane-dense output tile
        ),
        compiler_params=pltpu.CompilerParams(
            dimension_semantics=("parallel",),   # batch tiles shard across v7x's 2 TCs
            vmem_limit_bytes=32 * 1024 * 1024,   # headroom for fat tiles on v5e/v7x
            allow_input_fusion=[0],              # fuse x cast+pad into the pallas input
        ),
    )(xb, w1, b1, w2, b2, w3, b3, w4p, b4p)

    # Only column 0 is the real sigmoid(logit); drop padded batch rows.
    return out[:B, :1]


def init_params(key, input_dim, hidden_dim, *, lane=128):
    """PyTorch-style uniform(+/- 1/sqrt(fan_in)) init.

    W1 rows are zero-padded to a multiple of 128 (matches zero-padded x columns);
    the final Linear(hidden_dim, 1) is zero-padded to `lane` columns (MXU min width).
    Weights are cast to bf16; biases stay f32 (added to the f32 accumulator).
    """
    d_in_pad = ((input_dim + lane - 1) // lane) * lane
    keys = jax.random.split(key, 8)

    def linear(kw, kb, fan_in, fan_out):
        bound = float(fan_in) ** -0.5
        w = jax.random.uniform(kw, (fan_in, fan_out), jnp.float32, -bound, bound)
        b = jax.random.uniform(kb, (1, fan_out), jnp.float32, -bound, bound)
        return w, b

    w1, b1 = linear(keys[0], keys[1], input_dim, hidden_dim)
    w2, b2 = linear(keys[2], keys[3], hidden_dim, hidden_dim)
    w3, b3 = linear(keys[4], keys[5], hidden_dim, hidden_dim)
    w4, b4 = linear(keys[6], keys[7], hidden_dim, 1)

    w1p = jnp.zeros((d_in_pad, hidden_dim), jnp.float32).at[:input_dim, :].set(w1)
    w4p = jnp.zeros((hidden_dim, lane), jnp.float32).at[:, :1].set(w4)
    b4p = jnp.zeros((1, lane), jnp.float32).at[:, :1].set(b4)

    bf = lambda w: w.astype(jnp.bfloat16)
    return (bf(w1p), b1, bf(w2), b2, bf(w3), b3, bf(w4p), b4p)


def _reference_forward(x, params):
    """Pure-JAX reference mirroring the kernel's bf16-input / f32-accumulate math."""
    w1, b1, w2, b2, w3, b3, w4p, b4p = params
    d_in_pad = w1.shape[0]
    xb = x.astype(jnp.bfloat16)
    xb = jnp.pad(xb, ((0, 0), (0, d_in_pad - x.shape[1])))

    def leaky(h):
        return jnp.maximum(h, 0.2 * h)

    h = leaky(jnp.dot(xb, w1, preferred_element_type=jnp.float32) + b1)
    h = leaky(jnp.dot(h.astype(jnp.bfloat16), w2, preferred_element_type=jnp.float32) + b2)
    h = leaky(jnp.dot(h.astype(jnp.bfloat16), w3, preferred_element_type=jnp.float32) + b3)
    logits = jnp.dot(h.astype(jnp.bfloat16), w4p, preferred_element_type=jnp.float32) + b4p
    return jax.nn.sigmoid(logits[:, :1])


if __name__ == "__main__":
    # Small stand-ins for input_dim=1440, hidden_dim=256 (same structure, scaled down).
    batch = 200          # not a multiple of 128 on purpose: exercises batch padding (-> 256, 2 tiles)
    input_dim = 360      # not 128-aligned on purpose: exercises lane padding (-> 384)
    hidden_dim = 128

    key = jax.random.PRNGKey(0)
    k_params, k_x = jax.random.split(key)

    params = init_params(k_params, input_dim, hidden_dim)
    x = jax.random.normal(k_x, (batch, input_dim), jnp.float32)

    out = jax.block_until_ready(discriminator_forward(x, params))
    ref = _reference_forward(x, params)

    assert out.shape == (batch, 1), out.shape
    assert jnp.allclose(out, ref, atol=1e-2, rtol=1e-2), float(jnp.max(jnp.abs(out - ref)))

    print("KERNEL_OK")
</pallas_src>

<mosaic_0001>
module attributes {stable_mosaic.version = 11 : i64} {
  func.func @_disc_kernel(%arg0: i32, %arg1: memref<128x384xbf16, #tpu.memory_space<vmem>>, %arg2: memref<384x128xbf16, #tpu.memory_space<vmem>>, %arg3: memref<1x128xf32, #tpu.memory_space<vmem>>, %arg4: memref<128x128xbf16, #tpu.memory_space<vmem>>, %arg5: memref<1x128xf32, #tpu.memory_space<vmem>>, %arg6: memref<128x128xbf16, #tpu.memory_space<vmem>>, %arg7: memref<1x128xf32, #tpu.memory_space<vmem>>, %arg8: memref<128x128xbf16, #tpu.memory_space<vmem>>, %arg9: memref<1x128xf32, #tpu.memory_space<vmem>>, %arg10: memref<128x128xf32, #tpu.memory_space<vmem>>) attributes {dimension_semantics = [#tpu.dimension_semantics<parallel>], iteration_bounds = array<i64: 2>, scalar_prefetch = 0 : i64, scratch_operands = 0 : i64, tpu.core_type = #tpu.core_type<tc>, window_params = [{transform_indices = @transform_0, window_bounds = array<i64: 128, 384>}, {pipeline_mode = #tpu.pipeline_mode<synchronous>, transform_indices = @transform_1, window_bounds = array<i64: 384, 128>}, {pipeline_mode = #tpu.pipeline_mode<synchronous>, transform_indices = @transform_2, window_bounds = array<i64: 1, 128>}, {pipeline_mode = #tpu.pipeline_mode<synchronous>, transform_indices = @transform_3, window_bounds = array<i64: 128, 128>}, {pipeline_mode = #tpu.pipeline_mode<synchronous>, transform_indices = @transform_4, window_bounds = array<i64: 1, 128>}, {pipeline_mode = #tpu.pipeline_mode<synchronous>, transform_indices = @transform_5, window_bounds = array<i64: 128, 128>}, {pipeline_mode = #tpu.pipeline_mode<synchronous>, transform_indices = @transform_6, window_bounds = array<i64: 1, 128>}, {pipeline_mode = #tpu.pipeline_mode<synchronous>, transform_indices = @transform_7, window_bounds = array<i64: 128, 128>}, {pipeline_mode = #tpu.pipeline_mode<synchronous>, transform_indices = @transform_8, window_bounds = array<i64: 1, 128>}, {transform_indices = @transform_9, window_bounds = array<i64: 128, 128>}]} {
    %c0 = arith.constant 0 : index
    %c0_0 = arith.constant 0 : index
    %0 = vector.load %arg1[%c0, %c0_0] : memref<128x384xbf16, #tpu.memory_space<vmem>>, vector<128x384xbf16>
    %c0_1 = arith.constant 0 : index
    %c0_2 = arith.constant 0 : index
    %1 = vector.load %arg2[%c0_1, %c0_2] : memref<384x128xbf16, #tpu.memory_space<vmem>>, vector<384x128xbf16>
    %cst = arith.constant dense<0.000000e+00> : vector<128x128xf32>
    %2 = tpu.matmul %0, %1, %cst {dimension_numbers = #tpu.dot_dimension_numbers<[1], [0], [0], [1], [0, 0, 1, 1], [], []>} : vector<128x384xbf16>, vector<384x128xbf16>, vector<128x128xf32> -> vector<128x128xf32>
    %c0_3 = arith.constant 0 : index
    %c0_4 = arith.constant 0 : index
    %3 = vector.load %arg3[%c0_3, %c0_4] : memref<1x128xf32, #tpu.memory_space<vmem>>, vector<1x128xf32>
    %4 = vector.broadcast %3 : vector<1x128xf32> to vector<128x128xf32>
    %5 = arith.addf %2, %4 : vector<128x128xf32>
    %cst_5 = arith.constant 2.000000e-01 : f32
    %6 = vector.broadcast %cst_5 : f32 to vector<128x128xf32>
    %7 = arith.mulf %6, %5 : vector<128x128xf32>
    %8 = arith.maximumf %5, %7 : vector<128x128xf32>
    %9 = arith.truncf %8 : vector<128x128xf32> to vector<128x128xbf16>
    %c0_6 = arith.constant 0 : index
    %c0_7 = arith.constant 0 : index
    %10 = vector.load %arg4[%c0_6, %c0_7] : memref<128x128xbf16, #tpu.memory_space<vmem>>, vector<128x128xbf16>
    %cst_8 = arith.constant dense<0.000000e+00> : vector<128x128xf32>
    %11 = tpu.matmul %9, %10, %cst_8 {dimension_numbers = #tpu.dot_dimension_numbers<[1], [0], [0], [1], [0, 0, 1, 1], [], []>} : vector<128x128xbf16>, vector<128x128xbf16>, vector<128x128xf32> -> vector<128x128xf32>
    %c0_9 = arith.constant 0 : index
    %c0_10 = arith.constant 0 : index
    %12 = vector.load %arg5[%c0_9, %c0_10] : memref<1x128xf32, #tpu.memory_space<vmem>>, vector<1x128xf32>
    %13 = vector.broadcast %12 : vector<1x128xf32> to vector<128x128xf32>
    %14 = arith.addf %11, %13 : vector<128x128xf32>
    %cst_11 = arith.constant 2.000000e-01 : f32
    %15 = vector.broadcast %cst_11 : f32 to vector<128x128xf32>
    %16 = arith.mulf %15, %14 : vector<128x128xf32>
    %17 = arith.maximumf %14, %16 : vector<128x128xf32>
    %18 = arith.truncf %17 : vector<128x128xf32> to vector<128x128xbf16>
    %c0_12 = arith.constant 0 : index
    %c0_13 = arith.constant 0 : index
    %19 = vector.load %arg6[%c0_12, %c0_13] : memref<128x128xbf16, #tpu.memory_space<vmem>>, vector<128x128xbf16>
    %cst_14 = arith.constant dense<0.000000e+00> : vector<128x128xf32>
    %20 = tpu.matmul %18, %19, %cst_14 {dimension_numbers = #tpu.dot_dimension_numbers<[1], [0], [0], [1], [0, 0, 1, 1], [], []>} : vector<128x128xbf16>, vector<128x128xbf16>, vector<128x128xf32> -> vector<128x128xf32>
    %c0_15 = arith.constant 0 : index
    %c0_16 = arith.constant 0 : index
    %21 = vector.load %arg7[%c0_15, %c0_16] : memref<1x128xf32, #tpu.memory_space<vmem>>, vector<1x128xf32>
    %22 = vector.broadcast %21 : vector<1x128xf32> to vector<128x128xf32>
    %23 = arith.addf %20, %22 : vector<128x128xf32>
    %cst_17 = arith.constant 2.000000e-01 : f32
    %24 = vector.broadcast %cst_17 : f32 to vector<128x128xf32>
    %25 = arith.mulf %24, %23 : vector<128x128xf32>
    %26 = arith.maximumf %23, %25 : vector<128x128xf32>
    %27 = arith.truncf %26 : vector<128x128xf32> to vector<128x128xbf16>
    %c0_18 = arith.constant 0 : index
    %c0_19 = arith.constant 0 : index
    %28 = vector.load %arg8[%c0_18, %c0_19] : memref<128x128xbf16, #tpu.memory_space<vmem>>, vector<128x128xbf16>
    %cst_20 = arith.constant dense<0.000000e+00> : vector<128x128xf32>
    %29 = tpu.matmul %27, %28, %cst_20 {dimension_numbers = #tpu.dot_dimension_numbers<[1], [0], [0], [1], [0, 0, 1, 1], [], []>} : vector<128x128xbf16>, vector<128x128xbf16>, vector<128x128xf32> -> vector<128x128xf32>
    %c0_21 = arith.constant 0 : index
    %c0_22 = arith.constant 0 : index
    %30 = vector.load %arg9[%c0_21, %c0_22] : memref<1x128xf32, #tpu.memory_space<vmem>>, vector<1x128xf32>
    %31 = vector.broadcast %30 : vector<1x128xf32> to vector<128x128xf32>
    %32 = arith.addf %29, %31 : vector<128x128xf32>
    %33 = arith.negf %32 : vector<128x128xf32>
    %34 = math.exp %33 : vector<128x128xf32>
    %cst_23 = arith.constant 1.000000e+00 : f32
    %35 = vector.broadcast %cst_23 : f32 to vector<128x128xf32>
    %36 = arith.addf %35, %34 : vector<128x128xf32>
    %37 = arith.divf %35, %36 : vector<128x128xf32>
    %c0_24 = arith.constant 0 : index
    %c0_25 = arith.constant 0 : index
    %38 = vector.load %arg10[%c0_24, %c0_25] : memref<128x128xf32, #tpu.memory_space<vmem>>, vector<128x128xf32>
    tpu.vector_store %arg10[%c0_24, %c0_25], %37 {strides = array<i32>} : memref<128x128xf32, #tpu.memory_space<vmem>>, vector<128x128xf32>,
    return
  }
  func.func @transform_0(%arg0: i32) -> (i32, i32) {
    %c0_i32 = arith.constant 0 : i32
    %c0_i32_0 = arith.constant 0 : i32
    return %arg0, %c0_i32 : i32, i32
  }
  func.func @transform_1(%arg0: i32) -> (i32, i32) {
    %c0_i32 = arith.constant 0 : i32
    %c0_i32_0 = arith.constant 0 : i32
    %c0_i32_1 = arith.constant 0 : i32
    return %c0_i32, %c0_i32_0 : i32, i32
  }
  func.func @transform_2(%arg0: i32) -> (i32, i32) {
    %c0_i32 = arith.constant 0 : i32
    %c0_i32_0 = arith.constant 0 : i32
    %c0_i32_1 = arith.constant 0 : i32
    return %c0_i32, %c0_i32_0 : i32, i32
  }
  func.func @transform_3(%arg0: i32) -> (i32, i32) {
    %c0_i32 = arith.constant 0 : i32
    %c0_i32_0 = arith.constant 0 : i32
    %c0_i32_1 = arith.constant 0 : i32
    return %c0_i32, %c0_i32_0 : i32, i32
  }
  func.func @transform_4(%arg0: i32) -> (i32, i32) {
    %c0_i32 = arith.constant 0 : i32
    %c0_i32_0 = arith.constant 0 : i32
    %c0_i32_1 = arith.constant 0 : i32
    return %c0_i32, %c0_i32_0 : i32, i32
  }
  func.func @transform_5(%arg0: i32) -> (i32, i32) {
    %c0_i32 = arith.constant 0 : i32
    %c0_i32_0 = arith.constant 0 : i32
    %c0_i32_1 = arith.constant 0 : i32
    return %c0_i32, %c0_i32_0 : i32, i32
  }
  func.func @transform_6(%arg0: i32) -> (i32, i32) {
    %c0_i32 = arith.constant 0 : i32
    %c0_i32_0 = arith.constant 0 : i32
    %c0_i32_1 = arith.constant 0 : i32
    return %c0_i32, %c0_i32_0 : i32, i32
  }
  func.func @transform_7(%arg0: i32) -> (i32, i32) {
    %c0_i32 = arith.constant 0 : i32
    %c0_i32_0 = arith.constant 0 : i32
    %c0_i32_1 = arith.constant 0 : i32
    return %c0_i32, %c0_i32_0 : i32, i32
  }
  func.func @transform_8(%arg0: i32) -> (i32, i32) {
    %c0_i32 = arith.constant 0 : i32
    %c0_i32_0 = arith.constant 0 : i32
    %c0_i32_1 = arith.constant 0 : i32
    return %c0_i32, %c0_i32_0 : i32, i32
  }
  func.func @transform_9(%arg0: i32) -> (i32, i32) {
    %c0_i32 = arith.constant 0 : i32
    %c0_i32_0 = arith.constant 0 : i32
    return %arg0, %c0_i32 : i32, i32
  }
}

</mosaic_0001>

<bundles_post_ra>
// kernel: discriminator_forward.1
= control target key start
LH: loop header
LB: loop body
LE: loop exit
PB: predicated region body
PF: predicated region fallthrough
CT: control target
= control target key end

     0   :  { %s2255_s30 = smov 0   ;;  %s2548_s0 = inlined_call_operand.vmem [shape: bf16[256,384], index: 0, kind: input, shape index: {}]   ;;  %s2549_s1 = inlined_call_operand.vmem [shape: bf16[384,128], index: 1, kind: input, shape index: {}]   ;;  %s2550_s2 = inlined_call_operand.vmem [shape: f32[1,128], index: 2, kind: input, shape index: {}]   ;;  %s2551_s3 = inlined_call_operand.vmem [shape: bf16[128,128], index: 3, kind: input, shape index: {}]   ;;  %s2552_s4 = inlined_call_operand.vmem [shape: f32[1,128], index: 4, kind: input, shape index: {}]   ;;  %s2553_s5 = inlined_call_operand.vmem [shape: bf16[128,128], index: 5, kind: input, shape index: {}]   ;;  %s2554_s6 = inlined_call_operand.vmem [shape: f32[1,128], index: 6, kind: input, shape index: {}]   ;;  %s2555_s7 = inlined_call_operand.vmem [shape: bf16[128,128], index: 7, kind: input, shape index: {}]   ;;  %s2556_s8 = inlined_call_operand.vmem [shape: f32[1,128], index: 8, kind: input, shape index: {}]   ;;  %s2557_s9 = inlined_call_operand.vmem [shape: f32[256,128], index: 9, kind: output, shape index: {}]  }
   0x1 LB: > { %s1685_s10 = sadd.s32 4294967295, %s2203_s30   ;;  %p1689_p0 = scmp.ge.s32.totalorder %s2203_s30, 1  ;;  %s2203_s30 = sphi %s2255_s30, %s19_s30  }
   0x2   : > { %p289_p1 = scmp.lt.s32.totalorder %s2203_s30, 3 }
   0x4   : > { %p290_p2 = pnand %p1689_p0, %p289_p1 }
   0x5   : > { %s1690_s25 = sshll.u32 (!%p290_p2), %s1685_s10, 4 }
   0x6   : > { %293 = sbr.rel (%p290_p2) target bundleno = 962 (0x3c2), region = 56  ;;  %p327_p3 = scmp.lt.s32.totalorder (!%p290_p2), %s1690_s25, 31 }
   0xb   : > { %v2053_v0 = vld [vmem:[%s2549_s1 + $0x78] sm:$0xff]   ;;  %v2055_v2 = vld [vmem:[%s2549_s1 + $0x70] sm:$0xff]   ;;  %v2058_v5 = vld [vmem:[%s2549_s1 + $0x68] sm:$0xff]   ;;  %s2559_s25 = smov (!%p327_p3, %s1690_s25), 31 }
   0xc   : > { %v2054_v1 = vld [vmem:[%s2549_s1 + $0x38] sm:$0xff]   ;;  %1788 = vmatprep.subr.bf16.mxu0 %v2053_v0  ;;  %v2057_v4 = vld [vmem:[%s2549_s1 + $0x30] sm:$0xff]   ;;  %v2060_v7 = vld [vmem:[%s2549_s1 + $0x28] sm:$0xff]   ;;  %s2044_s24 = smul.u32 12, %s2559_s25 }
   0xd   : > { %1789 = vmatpush3.bf16.msra.mxu0 %v2054_v1  ;;  %v2056_v3 = vld [vmem:[%s2549_s1 + $0xb8] sm:$0xff]   ;;  %v2059_v6 = vld [vmem:[%s2549_s1 + $0xb0] sm:$0xff]   ;;  %v2061_v8 = vld [vmem:[%s2549_s1 + $0x60] sm:$0xff]  }
   0xe   : > { %1790 = vmatprep.subr.bf16.mxu0 %v2055_v2  ;;  %1916 = vmatprep.subr.bf16.mxu1 %v2056_v3  ;;  %v2062_v9 = vld [vmem:[%s2549_s1 + $0xa8] sm:$0xff]   ;;  %v2063_v10 = vld [vmem:[%s2549_s1 + $0x20] sm:$0xff]   ;;  %v2064_v11 = vld [vmem:[%s2549_s1 + $0x58] sm:$0xff]   ;;  %s2329_s16 = scalar_lea.vmem %s2548_s0, %s2044_s24  ;;  %s1693_s24 = sshll.u32 %s2559_s25, 3 }
   0xf   : > { %1917 = vmatpush3.bf16.msra.mxu1 %v2056_v3  ;;  %v2065_v12 = vld [vmem:[%s2549_s1 + $0xa0] sm:$0xff]   ;;  %v2066_v13 = vld [vmem:[%s2549_s1 + $0x18] sm:$0xff]   ;;  %v2067_v15 = vld [vmem:[%s2549_s1 + $0x50] sm:$0xff]   ;;  %s2519_s28 = scalar_lea.vmem %s2557_s9, %s1693_s24 }
  0x10   : > { %1918 = vmatprep.subr.bf16.mxu1 %v2059_v6  ;;  %v2068_v14 = vld [vmem:[%s2549_s1 + $0x98] sm:$0xff]   ;;  %v2069_v16 = vld [vmem:[%s2549_s1 + $0x10] sm:$0xff]   ;;  %v2070_v18 = vld [vmem:[%s2549_s1 + $0x48] sm:$0xff]  }
  0x11   : > { %1791 = vmatpush3.bf16.msra.mxu0 %v2057_v4  ;;  %v2071_v17 = vld [vmem:[%s2549_s1 + $0x90] sm:$0xff]   ;;  %v2072_v19 = vld [vmem:[%s2549_s1 + $0x8] sm:$0xff]   ;;  %v2073_v20 = vld [vmem:[%s2549_s1 + $0x40] sm:$0xff]  }
  0x12   : > { %1792 = vmatprep.subr.bf16.mxu0 %v2058_v5  ;;  %v2074_v21 = vld [vmem:[%s2549_s1 + $0x88] sm:$0xff]   ;;  %v2078_v22 = vld [vmem:[%s2329_s16 + $0x4] ss:$12 sps:$4 sm:$0xff]   ;;  %v2085_v31 = vld [vmem:[%s2329_s16 + $0x34] ss:$12 sps:$4 sm:$0xff]  }
  0x13   : > { %1919 = vmatpush3.bf16.msra.mxu1 %v2059_v6  ;;  %v2075_v23 = vld [vmem:[%s2549_s1] sm:$0xff]   ;;  %731 = vmatprep.mubr.bf16.mxu0 %v2078_v22  ;;  %v2080_v24 = vld [vmem:[%s2329_s16 + $0x8] ss:$12 sps:$4 sm:$0xff]   ;;  %v2089_v32 = vld [vmem:[%s2329_s16 + $0x50] ss:$12 sps:$4 sm:$0xff]  }
  0x14   : > { %1920 = vmatprep.subr.bf16.mxu1 %v2062_v9  ;;  %v2079_v25 = vld [vmem:[%s2549_s1 + $0x80] sm:$0xff]   ;;  %1932 = vmatprep.mubr.bf16.mxu1 %v2080_v24  ;;  %v2082_v27 = vld [vmem:[%s2329_s16 + $0x1c] ss:$12 sps:$4 sm:$0xff]   ;;  %v2110_v36 = vld [vmem:[%s2551_s3 + $0x30] sm:$0xff]  }
  0x15   : > { %1793 = vmatpush3.bf16.msra.mxu0 %v2060_v7  ;;  %v2076_v26 = vld [vmem:[%s2329_s16] ss:$12 sps:$4 sm:$0xff]   ;;  %v2088_v29 = vld [vmem:[%s2329_s16 + $0x38] ss:$12 sps:$4 sm:$0xff]   ;;  %v2096_v33 = vld [vmem:[%s2329_s16 + $0x68] ss:$12 sps:$4 sm:$0xff]  }
  0x16   : > { %1794 = vmatprep.subr.bf16.mxu0 %v2061_v8  ;;  %v2081_v28 = vld [vmem:[%s2329_s16 + $0x20] ss:$12 sps:$4 sm:$0xff]   ;;  %v2084_v30 = vld [vmem:[%s2329_s16 + $0x18] ss:$12 sps:$4 sm:$0xff]   ;;  %v2087_v35 = vld [vmem:[%s2329_s16 + $0x30] ss:$12 sps:$4 sm:$0xff]  }
  0x17   : > { %1921 = vmatpush3.bf16.msra.mxu1 %v2062_v9  ;;  %v2109_v34 = vld [vmem:[%s2551_s3 + $0x38] sm:$0xff]   ;;  %v2097_v38 = vld [vmem:[%s2329_s16 + $0x80] ss:$12 sps:$4 sm:$0xff]   ;;  %v2092_v40 = vld [vmem:[%s2329_s16 + $0x48] ss:$12 sps:$4 sm:$0xff]  }
  0x18   : > { %1922 = vmatprep.subr.bf16.mxu1 %v2065_v12  ;;  %v2090_v37 = vld [vmem:[%s2329_s16 + $0x4c] ss:$12 sps:$4 sm:$0xff]   ;;  %v2093_v41 = vld [vmem:[%s2329_s16 + $0x64] ss:$12 sps:$4 sm:$0xff]   ;;  %v2098_v44 = vld [vmem:[%s2329_s16 + $0x7c] ss:$12 sps:$4 sm:$0xff]  }
  0x19   : > { %1795 = vmatpush3.bf16.msra.mxu0 %v2063_v10  ;;  %v2104_v39 = vld [vmem:[%s2329_s16 + $0x98] ss:$12 sps:$4 sm:$0xff]   ;;  %v2105_v42 = vld [vmem:[%s2329_s16 + $0xb0] ss:$12 sps:$4 sm:$0xff]   ;;  %v2095_v43 = vld [vmem:[%s2329_s16 + $0x60] ss:$12 sps:$4 sm:$0xff]  }
  0x1a   : > { %1796 = vmatprep.subr.bf16.mxu0 %v2064_v11  ;;  %v2100_v45 = vld [vmem:[%s2329_s16 + $0x78] ss:$12 sps:$4 sm:$0xff]   ;;  %v2101_v46 = vld [vmem:[%s2329_s16 + $0x94] ss:$12 sps:$4 sm:$0xff]   ;;  %v2103_v47 = vld [vmem:[%s2329_s16 + $0x90] ss:$12 sps:$4 sm:$0xff]  }
  0x1b   : > { %1923 = vmatpush3.bf16.msra.mxu1 %v2065_v12  ;;  %v2106_v48 = vld [vmem:[%s2329_s16 + $0xac] ss:$12 sps:$4 sm:$0xff]   ;;  %v2108_v49 = vld [vmem:[%s2329_s16 + $0xa8] ss:$12 sps:$4 sm:$0xff]   ;;  %v2112_v51 = vld [vmem:[%s2551_s3 + $0x20] sm:$0xff]  }
  0x1c   : > { %1924 = vmatprep.subr.bf16.mxu1 %v2068_v14  ;;  %v2111_v50 = vld [vmem:[%s2551_s3 + $0x28] sm:$0xff]   ;;  %v2113_v52 = vld [vmem:[%s2551_s3 + $0x18] sm:$0xff]   ;;  %v2114_v53 = vld [vmem:[%s2551_s3 + $0x10] sm:$0xff]  }
  0x1d   : > { %1797 = vmatpush3.bf16.msra.mxu0 %v2066_v13  ;;  %v2115_v54 = vld [vmem:[%s2551_s3 + $0x8] sm:$0xff]   ;;  %v2116_v55 = vld [vmem:[%s2551_s3] sm:$0xff]   ;;  %v2117_v56 = vld [vmem:[%s2553_s5 + $0x38] sm:$0xff]  }
  0x1e   : > { %1798 = vmatprep.subr.bf16.mxu0 %v2067_v15  ;;  %v2118_v57 = vld [vmem:[%s2553_s5 + $0x30] sm:$0xff]   ;;  %v2119_v58 = vld [vmem:[%s2553_s5 + $0x28] sm:$0xff]   ;;  %v2120_v59 = vld [vmem:[%s2553_s5 + $0x20] sm:$0xff]  }
  0x1f   : > { %1925 = vmatpush3.bf16.msra.mxu1 %v2068_v14  ;;  %v2406_v62 = vld [vmem:[%s2550_s2] ss:$0 sm:$0xff] }
  0x20   : > { %1926 = vmatprep.subr.bf16.mxu1 %v2071_v17 }
  0x21   : > { %1799 = vmatpush3.bf16.msra.mxu0 %v2069_v16 }
  0x22   : > { %1800 = vmatprep.subr.bf16.mxu0 %v2070_v18 }
  0x23   : > { %1927 = vmatpush3.bf16.msra.mxu1 %v2071_v17 }
  0x24   : > { %1928 = vmatprep.subr.bf16.mxu1 %v2074_v21 }
  0x25   : > { %1801 = vmatpush3.bf16.msra.mxu0 %v2072_v19 }
  0x26   : > { %1802 = vmatprep.subr.bf16.mxu0 %v2073_v20 }
  0x27   : > { %1929 = vmatpush3.bf16.msra.mxu1 %v2074_v21 }
  0x28   : > { %1930 = vmatprep.subr.bf16.mxu1 %v2079_v25 }
  0x29   : > { %1803 = vmatpush3.bf16.msra.mxu0 %v2075_v23 }
  0x2a   : > { %1980 = vmatprep.subr.bf16.mxu0 %v2117_v56 }
  0x2b   : > { %1931 = vmatpush3.bf16.msra.mxu1 %v2079_v25 }
  0x2c   : > { %732 = vmatmul.mubr.bf16.vlgmr.msra.gmra.mxu0 %v2076_v26  ;;  %1948 = vmatprep.subr.bf16.mxu1 %v2109_v34 }
  0x2d   : > { %739 = vmatprep.mubr.bf16.mxu0 %v2082_v27  ;;  %1981 = vmatpush3.bf16.msra.mxu0 %v2117_v56 }
  0x2e   : > { %1933 = vmatmul.mubr.bf16.vlgmr.msra.gmra.mxu1 %v2081_v28  ;;  %1982 = vmatprep.subr.bf16.mxu0 %v2118_v57 }
  0x2f   : > { %1936 = vmatprep.mubr.bf16.mxu1 %v2088_v29  ;;  %1949 = vmatpush3.bf16.msra.mxu1 %v2109_v34 }
  0x30   : > { %1950 = vmatprep.subr.bf16.mxu1 %v2110_v36 }
  0x31   : > { %1983 = vmatpush3.bf16.msra.mxu0 %v2118_v57 }
  0x32   : > { %1984 = vmatprep.subr.bf16.mxu0 %v2119_v58 }
  0x33   : > { %1951 = vmatpush3.bf16.msra.mxu1 %v2110_v36 }
  0x34   : > { %740 = vmatmul.mubr.bf16.gmra.mxu0 %v2084_v30  ;;  %1952 = vmatprep.subr.bf16.mxu1 %v2111_v50 }
  0x35   : > { %747 = vmatprep.mubr.bf16.mxu0 %v2085_v31  ;;  %1985 = vmatpush3.bf16.msra.mxu0 %v2119_v58 }
  0x36   : > { %1937 = vmatmul.mubr.bf16.gmra.mxu1 %v2089_v32  ;;  %1986 = vmatprep.subr.bf16.mxu0 %v2120_v59 }
  0x37   : > { %1940 = vmatprep.mubr.bf16.mxu1 %v2096_v33  ;;  %1953 = vmatpush3.bf16.msra.mxu1 %v2111_v50 }
  0x38   : > { %1954 = vmatprep.subr.bf16.mxu1 %v2112_v51 }
  0x39   : > { %1987 = vmatpush3.bf16.msra.mxu0 %v2120_v59 }
  0x3b   : > { %1955 = vmatpush3.bf16.msra.mxu1 %v2112_v51 }
  0x3c   : > { %748 = vmatmul.mubr.bf16.gmra.mxu0 %v2087_v35  ;;  %1956 = vmatprep.subr.bf16.mxu1 %v2113_v52 }
  0x3d   : > { %755 = vmatprep.mubr.bf16.mxu0 %v2090_v37 }
  0x3e   : > { %1941 = vmatmul.mubr.bf16.gmra.mxu1 %v2097_v38 }
  0x3f   : > { %1944 = vmatprep.mubr.bf16.mxu1 %v2104_v39  ;;  %1957 = vmatpush3.bf16.msra.mxu1 %v2113_v52 }
  0x40   : > { %1958 = vmatprep.subr.bf16.mxu1 %v2114_v53 }
  0x43   : > { %1959 = vmatpush3.bf16.msra.mxu1 %v2114_v53 }
  0x44   : > { %756 = vmatmul.mubr.bf16.gmra.mxu0 %v2092_v40  ;;  %1960 = vmatprep.subr.bf16.mxu1 %v2115_v54 }
  0x45   : > { %763 = vmatprep.mubr.bf16.mxu0 %v2093_v41 }
  0x46   : > { %1945 = vmatmul.mubr.bf16.gmra.mxu1 %v2105_v42 }
  0x47   : > { %1961 = vmatpush3.bf16.msra.mxu1 %v2115_v54 }
  0x48   : > { %1962 = vmatprep.subr.bf16.mxu1 %v2116_v55 }
  0x4b   : > { %1963 = vmatpush3.bf16.msra.mxu1 %v2116_v55 }
  0x4c   : > { %764 = vmatmul.mubr.bf16.gmra.mxu0 %v2095_v43 }
  0x4d   : > { %771 = vmatprep.mubr.bf16.mxu0 %v2098_v44 }
  0x54   : > { %772 = vmatmul.mubr.bf16.gmra.mxu0 %v2100_v45 }
  0x55   : > { %779 = vmatprep.mubr.bf16.mxu0 %v2101_v46 }
  0x5c   : > { %780 = vmatmul.mubr.bf16.gmra.mxu0 %v2103_v47 }
  0x5d   : > { %787 = vmatprep.mubr.bf16.mxu0 %v2106_v48 }
  0x64   : > { %788 = vmatmul.mubr.bf16.gmra.mxu0 %v2108_v49 }
  0xec   : > { %v1804_v60 = vpop.f32.mrf.mxu0 }
  0xee   : > { %v1805_v61 = vpop.f32.mrf.mxu0  ;;  %v1934_v0 = vpop.f32.mrf.mxu1 }
  0xef   : > { %v1806_v63 = vadd.f32 %v1805_v61, %v1804_v60 }
  0xf0   : > { %v1807_v1 = vpop.f32.mrf.mxu0  ;;  %v830_v3 = vpop.f32.mrf.mxu1 }
  0xf1   : > { %v734_v2 = vadd.f32 %v1806_v63, %v2406_v62 }
  0xf2   : > { %v1808_v4 = vpop.f32.mrf.mxu0  ;;  %v1935_v7 = vpop.f32.mrf.mxu1 }
  0xf3   : > { %v1809_v5 = vadd.f32 %v1808_v4, %v1807_v1  ;;  %v831_v6 = vadd.f32 %v830_v3, %v734_v2 }
  0xf4   : > { %v1810_v8 = vpop.f32.mrf.mxu0  ;;  %v833_v10 = vpop.f32.mrf.mxu1 }
  0xf5   : > { %v737_v9 = vadd.f32 %v1809_v5, %v2406_v62  ;;  %v893_v12 = vmul.f32 0.2, %v831_v6 }
  0xf6   : > { %v1811_v11 = vpop.f32.mrf.mxu0  ;;  %v1938_v16 = vpop.f32.mrf.mxu1 }
  0xf7   : > { %v1812_v13 = vadd.f32 %v1811_v11, %v1810_v8  ;;  %v834_v14 = vadd.f32 %v833_v10, %v737_v9  ;;  %v909_v20 = vmax.f32 %v831_v6, %v893_v12 }
  0xf8   : > { %v1813_v15 = vpop.f32.mrf.mxu0  ;;  %v846_v25 = vpop.f32.mrf.mxu1 }
  0xf9   : > { %v742_v17 = vadd.f32 %v1812_v13, %v2406_v62  ;;  %v894_v18 = vmul.f32 0.2, %v834_v14 }
  0xfa   : > { %v1814_v19 = vpop.f32.mrf.mxu0  ;;  %v1939_v33 = vpop.f32.mrf.mxu1 }
  0xfb   : > { %v839_v21 = vadd.f32 %v1934_v0, %v742_v17  ;;  %v910_v22 = vmax.f32 %v834_v14, %v894_v18  ;;  %v1815_v23 = vadd.f32 %v1814_v19, %v1813_v15 }
  0xfc   : > { %v1816_v24 = vpop.f32.mrf.mxu0  ;;  %v849_v42 = vpop.f32.mrf.mxu1 }
  0xfd   : > { %v745_v26 = vadd.f32 %v1815_v23, %v2406_v62  ;;  %v925_v27 = vpack.c.bf16 %v910_v22, %v909_v20  ;;  %v895_v29 = vmul.f32 0.2, %v839_v21 }
  0xfe   : > { %v1817_v28 = vpop.f32.mrf.mxu0  ;;  %v1942_v50 = vpop.f32.mrf.mxu1 }
  0xff   : > { %v842_v30 = vadd.f32 %v1935_v7, %v745_v26  ;;  %v1818_v31 = vadd.f32 %v1817_v28, %v1816_v24  ;;  %1964 = vmatprep.mubr.bf16.mxu1 %v925_v27  ;;  %v911_v37 = vmax.f32 %v839_v21, %v895_v29 }
 0x100   : > { %v1819_v32 = vpop.f32.mrf.mxu0  ;;  %v862_v59 = vpop.f32.mrf.mxu1 }
 0x101   : > { %v896_v34 = vmul.f32 0.2, %v842_v30  ;;  %v750_v35 = vadd.f32 %v1818_v31, %v2406_v62 }
 0x102   : > { %v1820_v36 = vpop.f32.mrf.mxu0  ;;  %v1943_v4 = vpop.f32.mrf.mxu1 }
 0x103   : > { %v912_v38 = vmax.f32 %v842_v30, %v896_v34  ;;  %v1821_v39 = vadd.f32 %v1820_v36, %v1819_v32  ;;  %v847_v40 = vadd.f32 %v846_v25, %v750_v35 }
 0x104   : > { %v1822_v41 = vpop.f32.mrf.mxu0  ;;  %v865_v13 = vpop.f32.mrf.mxu1 }
 0x105   : > { %v926_v43 = vpack.c.bf16 %v912_v38, %v911_v37  ;;  %v753_v44 = vadd.f32 %v1821_v39, %v2406_v62  ;;  %v897_v46 = vmul.f32 0.2, %v847_v40 }
 0x106   : > { %v1823_v45 = vpop.f32.mrf.mxu0  ;;  %v1946_v21 = vpop.f32.mrf.mxu1 }
 0x107   : > { %v1824_v47 = vadd.f32 %v1823_v45, %v1822_v41  ;;  %v850_v48 = vadd.f32 %v849_v42, %v753_v44  ;;  %1965 = vmatmul.mubr.bf16.vlgmr.msra.gmra.mxu1 %v926_v43  ;;  %v913_v54 = vmax.f32 %v847_v40, %v897_v46 }
 0x108   : > { %v1825_v49 = vpop.f32.mrf.mxu0  ;;  %v878_v30 = vpop.f32.mrf.mxu1 }
 0x109   : > { %v758_v51 = vadd.f32 %v1824_v47, %v2406_v62  ;;  %v898_v52 = vmul.f32 0.2, %v850_v48 }
 0x10a   : > { %v1826_v53 = vpop.f32.mrf.mxu0  ;;  %v1947_v38 = vpop.f32.mrf.mxu1 }
 0x10b   : > { %v855_v55 = vadd.f32 %v1938_v16, %v758_v51  ;;  %v914_v56 = vmax.f32 %v850_v48, %v898_v52  ;;  %v1827_v57 = vadd.f32 %v1826_v53, %v1825_v49 }
 0x10c   : > { %v1828_v58 = vpop.f32.mrf.mxu0  ;;  %v881_v47 = vpop.f32.mrf.mxu1 }
 0x10d   : > { %v761_v60 = vadd.f32 %v1827_v57, %v2406_v62  ;;  %v927_v61 = vpack.c.bf16 %v914_v56, %v913_v54  ;;  %v899_v0 = vmul.f32 0.2, %v855_v55 }
 0x10e   : > { %v1829_v63 = vpop.f32.mrf.mxu0 }
 0x10f   : > { %v858_v1 = vadd.f32 %v1939_v33, %v761_v60  ;;  %v1830_v2 = vadd.f32 %v1829_v63, %v1828_v58  ;;  %1968 = vmatprep.mubr.bf16.mxu1 %v927_v61  ;;  %v915_v10 = vmax.f32 %v855_v55, %v899_v0 }
 0x110   : > { %v1831_v3 = vpop.f32.mrf.mxu0 }
 0x111   : > { %v900_v5 = vmul.f32 0.2, %v858_v1  ;;  %v766_v6 = vadd.f32 %v1830_v2, %v2406_v62 }
 0x112   : > { %v1832_v7 = vpop.f32.mrf.mxu0 }
 0x113   : > { %v1833_v8 = vadd.f32 %v1832_v7, %v1831_v3  ;;  %v863_v9 = vadd.f32 %v862_v59, %v766_v6  ;;  %v916_v11 = vmax.f32 %v858_v1, %v900_v5  ;;  %v2121_v7 = vld [vmem:[%s2553_s5 + $0x18] sm:$0xff]  }
 0x114   : > { %v1834_v12 = vpop.f32.mrf.mxu0  ;;  %1988 = vmatprep.subr.bf16.mxu0 %v2121_v7 }
 0x115   : > { %v769_v14 = vadd.f32 %v1833_v8, %v2406_v62  ;;  %v928_v15 = vpack.c.bf16 %v916_v11, %v915_v10  ;;  %v901_v17 = vmul.f32 0.2, %v863_v9  ;;  %1989 = vmatpush3.bf16.msra.mxu0 %v2121_v7  ;;  %v2122_v8 = vld [vmem:[%s2553_s5 + $0x10] sm:$0xff]   ;;  %v2125_v10 = vld [vmem:[%s2555_s7 + $0x38] sm:$0xff]  }
 0x116   : > { %v1835_v16 = vpop.f32.mrf.mxu0  ;;  %1990 = vmatprep.subr.bf16.mxu0 %v2122_v8  ;;  %v2126_v11 = vld [vmem:[%s2555_s7 + $0x30] sm:$0xff]   ;;  %2012 = vmatprep.subr.bf16.mxu1 %v2125_v10 }
 0x117   : > { %v1836_v18 = vadd.f32 %v1835_v16, %v1834_v12  ;;  %v866_v19 = vadd.f32 %v865_v13, %v769_v14  ;;  %1969 = vmatmul.mubr.bf16.gmra.mxu1 %v928_v15  ;;  %v917_v25 = vmax.f32 %v863_v9, %v901_v17  ;;  %v2124_v9 = vld [vmem:[%s2553_s5] sm:$0xff]   ;;  %v2127_v12 = vld [vmem:[%s2555_s7 + $0x28] sm:$0xff]  }
 0x118   : > { %v1837_v20 = vpop.f32.mrf.mxu0  ;;  %2013 = vmatpush3.bf16.msra.mxu1 %v2125_v10  ;;  %v2128_v13 = vld [vmem:[%s2555_s7 + $0x20] sm:$0xff]  }
 0x119   : > { %v774_v22 = vadd.f32 %v1836_v18, %v2406_v62  ;;  %v902_v23 = vmul.f32 0.2, %v866_v19  ;;  %1991 = vmatpush3.bf16.msra.mxu0 %v2122_v8  ;;  %2014 = vmatprep.subr.bf16.mxu1 %v2126_v11  ;;  %v2451_v15 = vld [vmem:[%s2552_s4] ss:$0 sm:$0xff] }
 0x11a   : > { %v1838_v24 = vpop.f32.mrf.mxu0 }
 0x11b   : > { %v871_v26 = vadd.f32 %v1942_v50, %v774_v22  ;;  %v918_v27 = vmax.f32 %v866_v19, %v902_v23  ;;  %v1839_v28 = vadd.f32 %v1838_v24, %v1837_v20 }
 0x11c   : > { %v1840_v29 = vpop.f32.mrf.mxu0  ;;  %2015 = vmatpush3.bf16.msra.mxu1 %v2126_v11 }
 0x11d   : > { %v777_v31 = vadd.f32 %v1839_v28, %v2406_v62  ;;  %v929_v32 = vpack.c.bf16 %v918_v27, %v917_v25  ;;  %v903_v34 = vmul.f32 0.2, %v871_v26  ;;  %2016 = vmatprep.subr.bf16.mxu1 %v2127_v12 }
 0x11e   : > { %v1841_v33 = vpop.f32.mrf.mxu0 }
 0x11f   : > { %v874_v35 = vadd.f32 %v1943_v4, %v777_v31  ;;  %v1842_v36 = vadd.f32 %v1841_v33, %v1840_v29  ;;  %1972 = vmatprep.mubr.bf16.mxu1 %v929_v32  ;;  %v919_v44 = vmax.f32 %v871_v26, %v903_v34 }
 0x120   : > { %v1843_v37 = vpop.f32.mrf.mxu0  ;;  %2017 = vmatpush3.bf16.msra.mxu1 %v2127_v12 }
 0x121   : > { %v904_v39 = vmul.f32 0.2, %v874_v35  ;;  %v782_v40 = vadd.f32 %v1842_v36, %v2406_v62  ;;  %2018 = vmatprep.subr.bf16.mxu1 %v2128_v13 }
 0x122   : > { %v1844_v41 = vpop.f32.mrf.mxu0 }
 0x123   : > { %v1845_v42 = vadd.f32 %v1844_v41, %v1843_v37  ;;  %v879_v43 = vadd.f32 %v878_v30, %v782_v40  ;;  %v920_v45 = vmax.f32 %v874_v35, %v904_v39 }
 0x124   : > { %v1846_v46 = vpop.f32.mrf.mxu0  ;;  %2019 = vmatpush3.bf16.msra.mxu1 %v2128_v13 }
 0x125   : > { %v785_v48 = vadd.f32 %v1845_v42, %v2406_v62  ;;  %v930_v49 = vpack.c.bf16 %v920_v45, %v919_v44  ;;  %v905_v51 = vmul.f32 0.2, %v879_v43 }
 0x126   : > { %v1847_v50 = vpop.f32.mrf.mxu0 }
 0x127   : > { %v1848_v52 = vadd.f32 %v1847_v50, %v1846_v46  ;;  %v882_v53 = vadd.f32 %v881_v47, %v785_v48  ;;  %1973 = vmatmul.mubr.bf16.gmra.mxu1 %v930_v49  ;;  %v921_v58 = vmax.f32 %v879_v43, %v905_v51 }
 0x128   : > { %v1849_v54 = vpop.f32.mrf.mxu0 }
 0x129   : > { %v790_v55 = vadd.f32 %v1848_v52, %v2406_v62  ;;  %v906_v56 = vmul.f32 0.2, %v882_v53 }
 0x12a   : > { %v1850_v57 = vpop.f32.mrf.mxu0 }
 0x12b   : > { %v887_v59 = vadd.f32 %v1946_v21, %v790_v55  ;;  %v922_v60 = vmax.f32 %v882_v53, %v906_v56  ;;  %v1851_v61 = vadd.f32 %v1850_v57, %v1849_v54 }
 0x12d   : > { %v793_v63 = vadd.f32 %v1851_v61, %v2406_v62  ;;  %v931_v0 = vpack.c.bf16 %v922_v60, %v921_v58  ;;  %v907_v1 = vmul.f32 0.2, %v887_v59  ;;  %v2123_v62 = vld [vmem:[%s2553_s5 + $0x8] sm:$0xff]  }
 0x12e   : > { %1992 = vmatprep.subr.bf16.mxu0 %v2123_v62 }
 0x12f   : > { %v890_v2 = vadd.f32 %v1947_v38, %v793_v63  ;;  %1976 = vmatprep.mubr.bf16.mxu1 %v931_v0  ;;  %v923_v4 = vmax.f32 %v887_v59, %v907_v1  ;;  %1993 = vmatpush3.bf16.msra.mxu0 %v2123_v62 }
 0x130   : > { %1994 = vmatprep.subr.bf16.mxu0 %v2124_v9 }
 0x131   : > { %v908_v3 = vmul.f32 0.2, %v890_v2 }
 0x133   : > { %v924_v5 = vmax.f32 %v890_v2, %v908_v3  ;;  %1995 = vmatpush3.bf16.msra.mxu0 %v2124_v9 }
 0x135   : > { %v932_v6 = vpack.c.bf16 %v924_v5, %v923_v4 }
 0x137   : > { %1977 = vmatmul.mubr.bf16.gmra.mxu1 %v932_v6 }
 0x1c7   : > { %v1966_v14 = vpop.f32.mrf.mxu1 }
 0x1c8   : > { %v1047_v18 = vadd.f32 %v1966_v14, %v2451_v15 }
 0x1c9   : > { %v1038_v16 = vpop.f32.mrf.mxu1 }
 0x1ca   : > { %v1039_v17 = vadd.f32 %v2451_v15, %v1038_v16  ;;  %v1103_v25 = vmul.f32 0.2, %v1047_v18 }
 0x1cb   : > { %v1967_v19 = vpop.f32.mrf.mxu1 }
 0x1cc   : > { %v1050_v20 = vadd.f32 %v1967_v19, %v2451_v15  ;;  %v1101_v22 = vmul.f32 0.2, %v1039_v17  ;;  %v1119_v30 = vmax.f32 %v1047_v18, %v1103_v25  ;;  %v2131_v25 = vld [vmem:[%s2555_s7 + $0x8] sm:$0xff]  }
 0x1cd   : > { %v1041_v21 = vpop.f32.mrf.mxu1 }
 0x1ce   : > { %v1104_v23 = vmul.f32 0.2, %v1050_v20  ;;  %v1042_v24 = vadd.f32 %v2451_v15, %v1041_v21  ;;  %v1117_v28 = vmax.f32 %v1039_v17, %v1101_v22 }
 0x1d0   : > { %v1102_v26 = vmul.f32 0.2, %v1042_v24  ;;  %v1120_v27 = vmax.f32 %v1050_v20, %v1104_v23 }
 0x1d2   : > { %v1118_v29 = vmax.f32 %v1042_v24, %v1102_v26  ;;  %v1134_v32 = vpack.c.bf16 %v1120_v27, %v1119_v30  ;;  %v2129_v24 = vld [vmem:[%s2555_s7 + $0x18] sm:$0xff]   ;;  %v2132_v26 = vld [vmem:[%s2555_s7] sm:$0xff]  }
 0x1d3   : > { %2020 = vmatprep.subr.bf16.mxu1 %v2129_v24 }
 0x1d4   : > { %v1133_v31 = vpack.c.bf16 %v1118_v29, %v1117_v28  ;;  %2021 = vmatpush3.bf16.msra.mxu1 %v2129_v24  ;;  %v2484_v28 = vld [vmem:[%s2554_s6] ss:$0 sm:$0xff] }
 0x1d6   : > { %1996 = vmatprep.mubr.bf16.mxu0 %v1133_v31 }
 0x1d7   : > { %v1970_v33 = vpop.f32.mrf.mxu1  ;;  %1997 = vmatmul.mubr.bf16.vlgmr.msra.gmra.mxu0 %v1134_v32 }
 0x1d8   : > { %v1063_v36 = vadd.f32 %v1970_v33, %v2451_v15 }
 0x1d9   : > { %v1054_v34 = vpop.f32.mrf.mxu1 }
 0x1da   : > { %v1055_v35 = vadd.f32 %v2451_v15, %v1054_v34  ;;  %v1107_v43 = vmul.f32 0.2, %v1063_v36 }
 0x1db   : > { %v1971_v37 = vpop.f32.mrf.mxu1 }
 0x1dc   : > { %v1066_v38 = vadd.f32 %v1971_v37, %v2451_v15  ;;  %v1105_v40 = vmul.f32 0.2, %v1055_v35  ;;  %v1123_v48 = vmax.f32 %v1063_v36, %v1107_v43 }
 0x1dd   : > { %v1057_v39 = vpop.f32.mrf.mxu1 }
 0x1de   : > { %v1108_v41 = vmul.f32 0.2, %v1066_v38  ;;  %v1058_v42 = vadd.f32 %v2451_v15, %v1057_v39  ;;  %v1121_v46 = vmax.f32 %v1055_v35, %v1105_v40 }
 0x1e0   : > { %v1106_v44 = vmul.f32 0.2, %v1058_v42  ;;  %v1124_v45 = vmax.f32 %v1066_v38, %v1108_v41 }
 0x1e2   : > { %v1122_v47 = vmax.f32 %v1058_v42, %v1106_v44  ;;  %v1136_v50 = vpack.c.bf16 %v1124_v45, %v1123_v48 }
 0x1e4   : > { %v1135_v49 = vpack.c.bf16 %v1122_v47, %v1121_v46 }
 0x1e6   : > { %2000 = vmatprep.mubr.bf16.mxu0 %v1135_v49 }
 0x1e7   : > { %v1974_v51 = vpop.f32.mrf.mxu1  ;;  %2001 = vmatmul.mubr.bf16.gmra.mxu0 %v1136_v50 }
 0x1e8   : > { %v1079_v54 = vadd.f32 %v1974_v51, %v2451_v15 }
 0x1e9   : > { %v1070_v52 = vpop.f32.mrf.mxu1 }
 0x1ea   : > { %v1071_v53 = vadd.f32 %v2451_v15, %v1070_v52  ;;  %v1111_v61 = vmul.f32 0.2, %v1079_v54 }
 0x1eb   : > { %v1975_v55 = vpop.f32.mrf.mxu1 }
 0x1ec   : > { %v1082_v56 = vadd.f32 %v1975_v55, %v2451_v15  ;;  %v1109_v58 = vmul.f32 0.2, %v1071_v53  ;;  %v1127_v3 = vmax.f32 %v1079_v54, %v1111_v61 }
 0x1ed   : > { %v1073_v57 = vpop.f32.mrf.mxu1 }
 0x1ee   : > { %v1112_v59 = vmul.f32 0.2, %v1082_v56  ;;  %v1074_v60 = vadd.f32 %v2451_v15, %v1073_v57  ;;  %v1125_v1 = vmax.f32 %v1071_v53, %v1109_v58 }
 0x1f0   : > { %v1110_v63 = vmul.f32 0.2, %v1074_v60  ;;  %v1128_v0 = vmax.f32 %v1082_v56, %v1112_v59 }
 0x1f2   : > { %v1126_v2 = vmax.f32 %v1074_v60, %v1110_v63  ;;  %v1138_v5 = vpack.c.bf16 %v1128_v0, %v1127_v3 }
 0x1f4   : > { %v1137_v4 = vpack.c.bf16 %v1126_v2, %v1125_v1 }
 0x1f6   : > { %2004 = vmatprep.mubr.bf16.mxu0 %v1137_v4 }
 0x1f7   : > { %v1978_v6 = vpop.f32.mrf.mxu1  ;;  %2005 = vmatmul.mubr.bf16.gmra.mxu0 %v1138_v5 }
 0x1f8   : > { %v1095_v62 = vadd.f32 %v1978_v6, %v2451_v15 }
 0x1f9   : > { %v1086_v7 = vpop.f32.mrf.mxu1 }
 0x1fa   : > { %v1087_v8 = vadd.f32 %v2451_v15, %v1086_v7  ;;  %v1115_v16 = vmul.f32 0.2, %v1095_v62 }
 0x1fb   : > { %v1979_v9 = vpop.f32.mrf.mxu1 }
 0x1fc   : > { %v1098_v10 = vadd.f32 %v1979_v9, %v2451_v15  ;;  %v1113_v12 = vmul.f32 0.2, %v1087_v8  ;;  %v1131_v21 = vmax.f32 %v1095_v62, %v1115_v16 }
 0x1fd   : > { %v1089_v11 = vpop.f32.mrf.mxu1 }
 0x1fe   : > { %v1116_v13 = vmul.f32 0.2, %v1098_v10  ;;  %v1090_v14 = vadd.f32 %v2451_v15, %v1089_v11  ;;  %v1129_v19 = vmax.f32 %v1087_v8, %v1113_v12  ;;  %v2130_v15 = vld [vmem:[%s2555_s7 + $0x10] sm:$0xff]  }
 0x1ff   : > { %2022 = vmatprep.subr.bf16.mxu1 %v2130_v15 }
 0x200   : > { %v1114_v17 = vmul.f32 0.2, %v1090_v14  ;;  %v1132_v18 = vmax.f32 %v1098_v10, %v1116_v13  ;;  %2023 = vmatpush3.bf16.msra.mxu1 %v2130_v15 }
 0x201   : > { %2024 = vmatprep.subr.bf16.mxu1 %v2131_v25 }
 0x202   : > { %v1130_v20 = vmax.f32 %v1090_v14, %v1114_v17  ;;  %v1140_v23 = vpack.c.bf16 %v1132_v18, %v1131_v21 }
 0x204   : > { %v1139_v22 = vpack.c.bf16 %v1130_v20, %v1129_v19  ;;  %2025 = vmatpush3.bf16.msra.mxu1 %v2131_v25 }
 0x205   : > { %2026 = vmatprep.subr.bf16.mxu1 %v2132_v26 }
 0x206   : > { %2008 = vmatprep.mubr.bf16.mxu0 %v1139_v22 }
 0x207   : > { %2009 = vmatmul.mubr.bf16.gmra.mxu0 %v1140_v23 }
 0x208   : > { %2027 = vmatpush3.bf16.msra.mxu1 %v2132_v26 }
 0x297   : > { %v1998_v27 = vpop.f32.mrf.mxu0 }
 0x298   : > { %v1255_v31 = vadd.f32 %v1998_v27, %v2484_v28 }
 0x299   : > { %v1246_v29 = vpop.f32.mrf.mxu0 }
 0x29a   : > { %v1247_v30 = vadd.f32 %v2484_v28, %v1246_v29  ;;  %v1311_v38 = vmul.f32 0.2, %v1255_v31 }
 0x29b   : > { %v1999_v32 = vpop.f32.mrf.mxu0 }
 0x29c   : > { %v1258_v33 = vadd.f32 %v1999_v32, %v2484_v28  ;;  %v1309_v35 = vmul.f32 0.2, %v1247_v30  ;;  %v1327_v43 = vmax.f32 %v1255_v31, %v1311_v38 }
 0x29d   : > { %v1249_v34 = vpop.f32.mrf.mxu0 }
 0x29e   : > { %v1312_v36 = vmul.f32 0.2, %v1258_v33  ;;  %v1250_v37 = vadd.f32 %v2484_v28, %v1249_v34  ;;  %v1325_v41 = vmax.f32 %v1247_v30, %v1309_v35 }
 0x2a0   : > { %v1310_v39 = vmul.f32 0.2, %v1250_v37  ;;  %v1328_v40 = vmax.f32 %v1258_v33, %v1312_v36 }
 0x2a2   : > { %v1326_v42 = vmax.f32 %v1250_v37, %v1310_v39  ;;  %v1342_v45 = vpack.c.bf16 %v1328_v40, %v1327_v43  ;;  %v2505_v37 = vld [vmem:[%s2556_s8] ss:$0 sm:$0xff] }
 0x2a4   : > { %v1341_v44 = vpack.c.bf16 %v1326_v42, %v1325_v41 }
 0x2a6   : > { %2028 = vmatprep.mubr.bf16.mxu1 %v1341_v44 }
 0x2a7   : > { %v2002_v46 = vpop.f32.mrf.mxu0  ;;  %2029 = vmatmul.mubr.bf16.vlgmr.msra.gmra.mxu1 %v1342_v45 }
 0x2a8   : > { %v1271_v49 = vadd.f32 %v2002_v46, %v2484_v28 }
 0x2a9   : > { %v1262_v47 = vpop.f32.mrf.mxu0 }
 0x2aa   : > { %v1263_v48 = vadd.f32 %v2484_v28, %v1262_v47  ;;  %v1315_v56 = vmul.f32 0.2, %v1271_v49 }
 0x2ab   : > { %v2003_v50 = vpop.f32.mrf.mxu0 }
 0x2ac   : > { %v1274_v51 = vadd.f32 %v2003_v50, %v2484_v28  ;;  %v1313_v53 = vmul.f32 0.2, %v1263_v48  ;;  %v1331_v61 = vmax.f32 %v1271_v49, %v1315_v56 }
 0x2ad   : > { %v1265_v52 = vpop.f32.mrf.mxu0 }
 0x2ae   : > { %v1316_v54 = vmul.f32 0.2, %v1274_v51  ;;  %v1266_v55 = vadd.f32 %v2484_v28, %v1265_v52  ;;  %v1329_v59 = vmax.f32 %v1263_v48, %v1313_v53 }
 0x2b0   : > { %v1314_v57 = vmul.f32 0.2, %v1266_v55  ;;  %v1332_v58 = vmax.f32 %v1274_v51, %v1316_v54 }
 0x2b2   : > { %v1330_v60 = vmax.f32 %v1266_v55, %v1314_v57  ;;  %v1344_v0 = vpack.c.bf16 %v1332_v58, %v1331_v61 }
 0x2b4   : > { %v1343_v63 = vpack.c.bf16 %v1330_v60, %v1329_v59 }
 0x2b6   : > { %2032 = vmatprep.mubr.bf16.mxu1 %v1343_v63 }
 0x2b7   : > { %v2006_v1 = vpop.f32.mrf.mxu0  ;;  %2033 = vmatmul.mubr.bf16.gmra.mxu1 %v1344_v0 }
 0x2b8   : > { %v1287_v4 = vadd.f32 %v2006_v1, %v2484_v28 }
 0x2b9   : > { %v1278_v2 = vpop.f32.mrf.mxu0 }
 0x2ba   : > { %v1279_v3 = vadd.f32 %v2484_v28, %v1278_v2  ;;  %v1319_v10 = vmul.f32 0.2, %v1287_v4 }
 0x2bb   : > { %v2007_v5 = vpop.f32.mrf.mxu0 }
 0x2bc   : > { %v1290_v6 = vadd.f32 %v2007_v5, %v2484_v28  ;;  %v1317_v8 = vmul.f32 0.2, %v1279_v3  ;;  %v1335_v16 = vmax.f32 %v1287_v4, %v1319_v10 }
 0x2bd   : > { %v1281_v7 = vpop.f32.mrf.mxu0 }
 0x2be   : > { %v1320_v62 = vmul.f32 0.2, %v1290_v6  ;;  %v1282_v9 = vadd.f32 %v2484_v28, %v1281_v7  ;;  %v1333_v13 = vmax.f32 %v1279_v3, %v1317_v8 }
 0x2c0   : > { %v1318_v11 = vmul.f32 0.2, %v1282_v9  ;;  %v1336_v12 = vmax.f32 %v1290_v6, %v1320_v62 }
 0x2c2   : > { %v1334_v14 = vmax.f32 %v1282_v9, %v1318_v11  ;;  %v1346_v18 = vpack.c.bf16 %v1336_v12, %v1335_v16 }
 0x2c4   : > { %v1345_v17 = vpack.c.bf16 %v1334_v14, %v1333_v13 }
 0x2c6   : > { %2036 = vmatprep.mubr.bf16.mxu1 %v1345_v17 }
 0x2c7   : > { %v2010_v19 = vpop.f32.mrf.mxu0  ;;  %2037 = vmatmul.mubr.bf16.gmra.mxu1 %v1346_v18 }
 0x2c8   : > { %v1303_v22 = vadd.f32 %v2010_v19, %v2484_v28 }
 0x2c9   : > { %v1294_v20 = vpop.f32.mrf.mxu0 }
 0x2ca   : > { %v1295_v21 = vadd.f32 %v2484_v28, %v1294_v20  ;;  %v1323_v29 = vmul.f32 0.2, %v1303_v22 }
 0x2cb   : > { %v2011_v23 = vpop.f32.mrf.mxu0 }
 0x2cc   : > { %v1306_v24 = vadd.f32 %v2011_v23, %v2484_v28  ;;  %v1321_v25 = vmul.f32 0.2, %v1295_v21  ;;  %v1339_v34 = vmax.f32 %v1303_v22, %v1323_v29 }
 0x2cd   : > { %v1297_v15 = vpop.f32.mrf.mxu0 }
 0x2ce   : > { %v1324_v26 = vmul.f32 0.2, %v1306_v24  ;;  %v1298_v27 = vadd.f32 %v2484_v28, %v1297_v15  ;;  %v1337_v32 = vmax.f32 %v1295_v21, %v1321_v25 }
 0x2d0   : > { %v1322_v30 = vmul.f32 0.2, %v1298_v27  ;;  %v1340_v31 = vmax.f32 %v1306_v24, %v1324_v26 }
 0x2d2   : > { %v1338_v33 = vmax.f32 %v1298_v27, %v1322_v30  ;;  %v1348_v36 = vpack.c.bf16 %v1340_v31, %v1339_v34 }
 0x2d4   : > { %v1347_v35 = vpack.c.bf16 %v1338_v33, %v1337_v32 }
 0x2d6   : > { %2040 = vmatprep.mubr.bf16.mxu1 %v1347_v35 }
 0x2d7   : > { %2041 = vmatmul.mubr.bf16.gmra.mxu1 %v1348_v36 }
 0x367   : > { %v2030_v38 = vpop.f32.mrf.mxu1 }
 0x368   : > { %v1463_v39 = vadd.f32 %v2030_v38, %v2505_v37 }
 0x369   : > { %v1454_v40 = vpop.f32.mrf.mxu1 }
 0x36a   : > { %v1772_v28 = vmul.f32 -1.442695, %v1463_v39  ;;  %v1455_v41 = vadd.f32 %v2505_v37, %v1454_v40 }
 0x36b   : > { %v2031_v42 = vpop.f32.mrf.mxu1 }
 0x36c   : > { %2133 = vpow2.f32 %v1772_v28  ;;  %v1770_v43 = vmul.f32 -1.442695, %v1455_v41  ;;  %v1466_v44 = vadd.f32 %v2031_v42, %v2505_v37 }
 0x36d   : > { %v1457_v45 = vpop.f32.mrf.mxu1 }
 0x36e   : > { %2135 = vpow2.f32 %v1770_v43  ;;  %v1773_v46 = vmul.f32 -1.442695, %v1466_v44  ;;  %v1458_v47 = vadd.f32 %v2505_v37, %v1457_v45 }
 0x370   : > { %2137 = vpow2.f32 %v1773_v46  ;;  %v1771_v48 = vmul.f32 -1.442695, %v1458_v47 }
 0x372   : > { %2139 = vpow2.f32 %v1771_v48 }
 0x377   : > { %v2034_v49 = vpop.f32.mrf.mxu1 }
 0x378   : > { %v1479_v50 = vadd.f32 %v2034_v49, %v2505_v37 }
 0x379   : > { %v2134_v51 = vpop.eup %2133  ;;  %v1470_v52 = vpop.f32.mrf.mxu1 }
 0x37a   : > { %v1567_v53 = vadd.f32 1.0, %v2134_v51  ;;  %v1776_v54 = vmul.f32 -1.442695, %v1479_v50  ;;  %v1471_v55 = vadd.f32 %v2505_v37, %v1470_v52 }
 0x37b   : > { %v2136_v56 = vpop.eup %2135  ;;  %v2035_v57 = vpop.f32.mrf.mxu1 }
 0x37c   : > { %2141 = vrcp.f32 %v1567_v53  ;;  %v1565_v58 = vadd.f32 1.0, %v2136_v56  ;;  %v1774_v59 = vmul.f32 -1.442695, %v1471_v55  ;;  %v1482_v60 = vadd.f32 %v2035_v57, %v2505_v37 }
 0x37d   : > { %v2138_v61 = vpop.eup %2137  ;;  %2143 = vpow2.f32 %v1776_v54  ;;  %v1473_v63 = vpop.f32.mrf.mxu1 }
 0x37e   : > { %2145 = vrcp.f32 %v1565_v58  ;;  %v1568_v0 = vadd.f32 1.0, %v2138_v61  ;;  %v1777_v1 = vmul.f32 -1.442695, %v1482_v60  ;;  %v1474_v2 = vadd.f32 %v2505_v37, %v1473_v63 }
 0x37f   : > { %v2140_v3 = vpop.eup %2139  ;;  %2147 = vpow2.f32 %v1774_v59 }
 0x380   : > { %2149 = vrcp.f32 %v1568_v0  ;;  %v1566_v4 = vadd.f32 1.0, %v2140_v3  ;;  %v1775_v5 = vmul.f32 -1.442695, %v1474_v2 }
 0x381   : > { %2151 = vpow2.f32 %v1777_v1 }
 0x382   : > { %2153 = vrcp.f32 %v1566_v4 }
 0x383   : > { %2155 = vpow2.f32 %v1775_v5 }
 0x387   : > { %v2038_v6 = vpop.f32.mrf.mxu1 }
 0x388   : > { %v1495_v7 = vadd.f32 %v2038_v6, %v2505_v37 }
 0x389   : > { %v2142_v8 = vpop.eup %2141  ;;  %v1486_v62 = vpop.f32.mrf.mxu1 }
 0x38a   : > { %v2144_v9 = vpop.eup %2143  ;;  %1615 = vst [vmem:[%s2519_s28 + $0x10] sm:$0xff] %v2142_v8  ;;  %v1780_v10 = vmul.f32 -1.442695, %v1495_v7  ;;  %v1487_v11 = vadd.f32 %v2505_v37, %v1486_v62 }
 0x38b   : > { %v2146_v12 = vpop.eup %2145  ;;  %v1571_v13 = vadd.f32 1.0, %v2144_v9  ;;  %v2039_v14 = vpop.f32.mrf.mxu1 }
 0x38c   : > { %v2148_v16 = vpop.eup %2147  ;;  %1613 = vst [vmem:[%s2519_s28] sm:$0xff] %v2146_v12  ;;  %2157 = vpow2.f32 %v1780_v10  ;;  %v1778_v17 = vmul.f32 -1.442695, %v1487_v11  ;;  %v1498_v18 = vadd.f32 %v2039_v14, %v2505_v37 }
 0x38d   : > { %v2150_v19 = vpop.eup %2149  ;;  %2159 = vrcp.f32 %v1571_v13  ;;  %v1569_v20 = vadd.f32 1.0, %v2148_v16  ;;  %v1489_v21 = vpop.f32.mrf.mxu1 }
 0x38e   : > { %v2152_v22 = vpop.eup %2151  ;;  %1616 = vst [vmem:[%s2519_s28 + $0x18] sm:$0xff] %v2150_v19  ;;  %2161 = vpow2.f32 %v1778_v17  ;;  %v1781_v23 = vmul.f32 -1.442695, %v1498_v18  ;;  %v1490_v24 = vadd.f32 %v2505_v37, %v1489_v21 }
 0x38f   : > { %v2154_v15 = vpop.eup %2153  ;;  %2163 = vrcp.f32 %v1569_v20  ;;  %v1572_v25 = vadd.f32 1.0, %v2152_v22 }
 0x390   : > { %v2156_v26 = vpop.eup %2155  ;;  %1614 = vst [vmem:[%s2519_s28 + $0x8] sm:$0xff] %v2154_v15  ;;  %2165 = vpow2.f32 %v1781_v23  ;;  %v1779_v27 = vmul.f32 -1.442695, %v1490_v24 }
 0x391   : > { %2167 = vrcp.f32 %v1572_v25  ;;  %v1570_v29 = vadd.f32 1.0, %v2156_v26 }
 0x392   : > { %2169 = vpow2.f32 %v1779_v27 }
 0x393   : > { %2171 = vrcp.f32 %v1570_v29 }
 0x397   : > { %v2042_v30 = vpop.f32.mrf.mxu1 }
 0x398   : > { %v1511_v31 = vadd.f32 %v2042_v30, %v2505_v37 }
 0x399   : > { %v2158_v32 = vpop.eup %2157  ;;  %v1502_v33 = vpop.f32.mrf.mxu1 }
 0x39a   : > { %v2160_v34 = vpop.eup %2159  ;;  %v1575_v35 = vadd.f32 1.0, %v2158_v32  ;;  %v1784_v36 = vmul.f32 -1.442695, %v1511_v31  ;;  %v1503_v38 = vadd.f32 %v2505_v37, %v1502_v33 }
 0x39b   : > { %v2162_v39 = vpop.eup %2161  ;;  %1619 = vst [vmem:[%s2519_s28 + $0x30] sm:$0xff] %v2160_v34  ;;  %v2043_v40 = vpop.f32.mrf.mxu1 }
 0x39c   : > { %v2164_v28 = vpop.eup %2163  ;;  %2173 = vrcp.f32 %v1575_v35  ;;  %v1573_v41 = vadd.f32 1.0, %v2162_v39  ;;  %v1782_v42 = vmul.f32 -1.442695, %v1503_v38  ;;  %v1514_v43 = vadd.f32 %v2043_v40, %v2505_v37 }
 0x39d   : > { %v2166_v44 = vpop.eup %2165  ;;  %1617 = vst [vmem:[%s2519_s28 + $0x20] sm:$0xff] %v2164_v28  ;;  %2175 = vpow2.f32 %v1784_v36  ;;  %v1505_v45 = vpop.f32.mrf.mxu1 }
 0x39e   : > { %v2168_v46 = vpop.eup %2167  ;;  %2177 = vrcp.f32 %v1573_v41  ;;  %v1576_v47 = vadd.f32 1.0, %v2166_v44  ;;  %v1785_v48 = vmul.f32 -1.442695, %v1514_v43  ;;  %v1506_v49 = vadd.f32 %v2505_v37, %v1505_v45 }
 0x39f   : > { %v2170_v50 = vpop.eup %2169  ;;  %1620 = vst [vmem:[%s2519_s28 + $0x38] sm:$0xff] %v2168_v46  ;;  %2179 = vpow2.f32 %v1782_v42 }
 0x3a0   : > { %v2172_v51 = vpop.eup %2171  ;;  %2181 = vrcp.f32 %v1576_v47  ;;  %v1574_v52 = vadd.f32 1.0, %v2170_v50  ;;  %v1783_v53 = vmul.f32 -1.442695, %v1506_v49 }
 0x3a1   : > { %1618 = vst [vmem:[%s2519_s28 + $0x28] sm:$0xff] %v2172_v51  ;;  %2183 = vpow2.f32 %v1785_v48 }
 0x3a2   : > { %2185 = vrcp.f32 %v1574_v52 }
 0x3a3   : > { %2187 = vpow2.f32 %v1783_v53 }
 0x3a9   : > { %v2174_v54 = vpop.eup %2173 }
 0x3aa   : > { %v2176_v55 = vpop.eup %2175  ;;  %1623 = vst [vmem:[%s2519_s28 + $0x50] sm:$0xff] %v2174_v54 }
 0x3ab   : > { %v2178_v56 = vpop.eup %2177  ;;  %v1579_v57 = vadd.f32 1.0, %v2176_v55 }
 0x3ac   : > { %v2180_v37 = vpop.eup %2179  ;;  %1621 = vst [vmem:[%s2519_s28 + $0x40] sm:$0xff] %v2178_v56 }
 0x3ad   : > { %v2182_v58 = vpop.eup %2181  ;;  %2189 = vrcp.f32 %v1579_v57  ;;  %v1577_v59 = vadd.f32 1.0, %v2180_v37 }
 0x3ae   : > { %v2184_v60 = vpop.eup %2183  ;;  %1624 = vst [vmem:[%s2519_s28 + $0x58] sm:$0xff] %v2182_v58 }
 0x3af   : > { %v2186_v61 = vpop.eup %2185  ;;  %2191 = vrcp.f32 %v1577_v59  ;;  %v1580_v63 = vadd.f32 1.0, %v2184_v60 }
 0x3b0   : > { %v2188_v0 = vpop.eup %2187  ;;  %1622 = vst [vmem:[%s2519_s28 + $0x48] sm:$0xff] %v2186_v61 }
 0x3b1   : > { %2193 = vrcp.f32 %v1580_v63  ;;  %v1578_v1 = vadd.f32 1.0, %v2188_v0 }
 0x3b3   : > { %2195 = vrcp.f32 %v1578_v1 }
 0x3ba   : > { %v2190_v2 = vpop.eup %2189 }
 0x3bb   : > { %1627 = vst [vmem:[%s2519_s28 + $0x70] sm:$0xff] %v2190_v2 }
 0x3bc   : > { %v2192_v3 = vpop.eup %2191 }
 0x3bd   : > { %1625 = vst [vmem:[%s2519_s28 + $0x60] sm:$0xff] %v2192_v3 }
 0x3be   : > { %v2194_v4 = vpop.eup %2193 }
 0x3bf   : > { %1628 = vst [vmem:[%s2519_s28 + $0x78] sm:$0xff] %v2194_v4 }
 0x3c0   : > { %v2196_v5 = vpop.eup %2195 }
 0x3c1   : > { %1626 = vst [vmem:[%s2519_s28 + $0x68] sm:$0xff] %v2196_v5 }
 0x3c2 PF: > { %s19_s30 = sadd.s32 1, %s2203_s30  }
 0x3c3   : > { %p16_p4 = scmp.ge.s32.totalorder %s19_s30, 4  }
 0x3c5   :  { %18 = sbr.rel (!%p16_p4) target bundleno = 1 (0x1), region = 86 }

</bundles_post_ra>
